<compile_context>
chip_gen: v7x
topology: tpu7x:2x2x1
jax: 0.10.0
libtpu: 0.0.40
codegen_flags: <defaults>
</compile_context>

<pallas_src>
import math
from functools import partial

import jax
import jax.numpy as jnp
from jax.experimental import pallas as pl
from jax.experimental.pallas import tpu as pltpu

_MIB = 1024 * 1024


def _round_up(x, m):
    return (x + m - 1) // m * m


def _patch_proj_kernel(x_ref, w_ref, b_ref, o_ref):
    # x_ref: (tm, K_pad) bf16 patch rows, w_ref: (K_pad, tn) bf16 (resident),
    # b_ref: (1, tn) f32, o_ref: (tm, tn) output dtype.
    acc = jnp.dot(x_ref[...], w_ref[...], preferred_element_type=jnp.float32)
    o_ref[...] = (acc + b_ref[...].astype(jnp.float32)).astype(o_ref.dtype)


def _plan_tiles(M, K_pad, D, block_m, block_n, compute_isz, bias_isz, out_isz,
                vmem_budget_bytes):
    """Pick (tm, tn, M_pad, D_pad, plan_bytes):
       (a) keep the weight resident (single D tile) when it fits the budget,
       (b) fit the whole double-buffered block plan in the budget,
       (c) minimize all-padding M rows."""
    block_m = _round_up(max(block_m, 128), 128)
    block_n = _round_up(max(block_n, 128), 128)
    D_full = _round_up(D, 128)

    def plan_bytes(tm, tn):
        # double-buffered input blocks + double-buffered output block
        return (2 * (tm * K_pad + K_pad * tn) * compute_isz
                + 2 * tn * bias_isz
                + 2 * tm * tn * out_isz)

    # Resident-weight path: one D tile -> constant weight/bias index maps,
    # weight DMA'd exactly once for the whole grid.
    if plan_bytes(128, D_full) <= vmem_budget_bytes:
        tn = D_full
    else:
        tn = min(block_n, D_full)
    D_pad = _round_up(D, tn)

    # Row tile: largest 128-multiple fitting the budget, preferring minimal
    # M padding waste (e.g. M=640: tm=128 pads to 640, not 1024).
    max_tm = min(block_m, _round_up(M, 128))
    candidates = [t for t in range(128, max_tm + 1, 128)
                  if plan_bytes(t, tn) <= vmem_budget_bytes]
    if not candidates:
        candidates = [128]
    tm = min(candidates, key=lambda t: (_round_up(M, t), -t))
    M_pad = _round_up(M, tm)
    return tm, tn, M_pad, D_pad, plan_bytes(tm, tn)


@partial(jax.jit, static_argnames=("patch_size", "block_m", "block_n",
                                   "compute_dtype", "vmem_budget_bytes"))
def linear_stem_forward(x, weight, bias, patch_size, block_m=512, block_n=256,
                        compute_dtype=jnp.bfloat16,
                        vmem_budget_bytes=32 * _MIB):
    """x: [B, C, H, W] (NCHW). weight: [D, C, P1, P2]. bias: [D].

    Returns [B, N1, N2, D] with N1=H//P1, N2=W//P2.
    """
    B, C, H, W = x.shape
    P1, P2 = patch_size
    D = weight.shape[0]
    assert H % P1 == 0 and W % P2 == 0
    N1, N2 = H // P1, W // P2
    K = C * P1 * P2
    M = B * N1 * N2

    out_dtype = x.dtype
    cdt = jnp.dtype(compute_dtype)
    out_isz = jnp.dtype(out_dtype).itemsize
    bias_isz = 4  # bias kept in f32

    # --- glue: extract non-overlapping patches, feature order (c, p1, p2) ---
    # (relies on allow_input_fusion to fold into the pallas input DMA)
    xp = x.reshape(B, C, N1, P1, N2, P2)
    xp = xp.transpose(0, 2, 4, 1, 3, 5)              # [B, N1, N2, C, P1, P2]
    patches = xp.reshape(M, K).astype(cdt)           # [M, K]   bf16 stream
    w_mat = weight.reshape(D, K).T.astype(cdt)       # [K, D]   bf16, conv flatten order
    b_mat = bias.reshape(1, D).astype(jnp.float32)   # [1, D]   f32

    # --- tile / padding plan (lane-dense, 128-aligned, VMEM-budgeted) ---
    K_pad = _round_up(K, 128)
    tm, tn, M_pad, D_pad, plan_bytes = _plan_tiles(
        M, K_pad, D, block_m, block_n, cdt.itemsize, bias_isz, out_isz,
        vmem_budget_bytes)

    if (M_pad != M) or (K_pad != K):
        patches = jnp.pad(patches, ((0, M_pad - M), (0, K_pad - K)))
    if (K_pad != K) or (D_pad != D):
        w_mat = jnp.pad(w_mat, ((0, K_pad - K), (0, D_pad - D)))
    if D_pad != D:
        b_mat = jnp.pad(b_mat, ((0, 0), (0, D_pad - D)))

    m_tiles = M_pad // tm
    d_tiles = D_pad // tn

    # Honest cost hint: per-operand itemsizes; weight re-read per M tile only
    # on the fallback 2-D grid.
    w_reads = 1 if d_tiles == 1 else m_tiles
    cost = pl.CostEstimate(
        flops=2 * M_pad * K_pad * D_pad,
        transcendentals=0,
        bytes_accessed=(M_pad * K_pad * cdt.itemsize
                        + K_pad * D_pad * w_reads * cdt.itemsize
                        + D_pad * bias_isz
                        + M_pad * D_pad * out_isz),
    )

    if d_tiles == 1:
        # Resident weight/bias (constant index maps -> DMA'd once); 1-D grid
        # over M shards cleanly across megacore TCs.
        grid = (m_tiles,)
        in_specs = [
            pl.BlockSpec((tm, K_pad), lambda i: (i, 0)),   # streamed patches
            pl.BlockSpec((K_pad, tn), lambda i: (0, 0)),   # resident weight
            pl.BlockSpec((1, tn), lambda i: (0, 0)),       # resident bias
        ]
        out_spec = pl.BlockSpec((tm, tn), lambda i: (i, 0))
        dims = ("parallel",)
    else:
        # Fallback for very large D: weight column-blocks, re-read per M tile
        # (cheaper than re-reading the M*K patch stream per D tile).
        grid = (m_tiles, d_tiles)
        in_specs = [
            pl.BlockSpec((tm, K_pad), lambda i, j: (i, 0)),
            pl.BlockSpec((K_pad, tn), lambda i, j: (0, j)),
            pl.BlockSpec((1, tn), lambda i, j: (0, j)),
        ]
        out_spec = pl.BlockSpec((tm, tn), lambda i, j: (i, j))
        dims = ("parallel", "parallel")

    # Explicit VMEM limit from the actual plan (+ headroom), safe on v5e/v6e/v7x.
    vmem_limit = min(max(32 * _MIB, plan_bytes + 8 * _MIB), 64 * _MIB)

    out_flat = pl.pallas_call(
        _patch_proj_kernel,
        out_shape=jax.ShapeDtypeStruct((M_pad, D_pad), out_dtype),
        grid_spec=pltpu.PrefetchScalarGridSpec(
            num_scalar_prefetch=0,
            grid=grid,
            in_specs=in_specs,
            out_specs=out_spec,
        ),
        compiler_params=pltpu.CompilerParams(
            dimension_semantics=dims,
            vmem_limit_bytes=vmem_limit,
            allow_input_fusion=[True, False, False],
        ),
        cost_estimate=cost,
    )(patches, w_mat, b_mat)

    out = out_flat[:M, :D]
    return out.reshape(B, N1, N2, D)


def init_params(key, in_channels, patch_size, emb_dim, dtype=jnp.float32):
    """Xavier-uniform on weight.flatten(1), zeros bias (matches _initialize_weights)."""
    P1, P2 = patch_size
    fan_in = in_channels * P1 * P2
    fan_out = emb_dim
    bound = math.sqrt(6.0 / (fan_in + fan_out))
    weight = jax.random.uniform(
        key, (emb_dim, in_channels, P1, P2), dtype=dtype, minval=-bound, maxval=bound
    )
    bias = jnp.zeros((emb_dim,), dtype=dtype)
    return weight, bias


if __name__ == "__main__":
    key = jax.random.PRNGKey(0)
    kx, kw = jax.random.split(key)

    B, C, H, W = 2, 4, 16, 16
    patch_size = (4, 4)
    emb_dim = 32

    x = jax.random.normal(kx, (B, C, H, W), dtype=jnp.float32)
    weight, bias = init_params(kw, C, patch_size, emb_dim)

    out = linear_stem_forward(x, weight, bias, patch_size)
    out = jax.block_until_ready(out)

    # reference checks
    P1, P2 = patch_size
    N1, N2 = H // P1, W // P2
    xp = x.reshape(B, C, N1, P1, N2, P2).transpose(0, 2, 4, 1, 3, 5)
    pat = xp.reshape(-1, C * P1 * P2)
    wK = weight.reshape(emb_dim, -1).T

    # same-precision reference (bf16 streams, f32 accumulate) - tight tolerance
    ref_bf16 = (
        jnp.dot(pat.astype(jnp.bfloat16), wK.astype(jnp.bfloat16),
                preferred_element_type=jnp.float32) + bias
    ).reshape(B, N1, N2, emb_dim).astype(jnp.float32)
    # all-f32 Conv2d-equivalent reference - loose tolerance (bf16 tradeoff)
    ref_f32 = (pat @ wK + bias).reshape(B, N1, N2, emb_dim)

    assert out.shape == (B, N1, N2, emb_dim)
    assert out.dtype == x.dtype
    assert jnp.allclose(out, ref_bf16, atol=2e-3, rtol=2e-3)
    assert jnp.allclose(out, ref_f32, atol=5e-2, rtol=5e-2)

    print("KERNEL_OK")
</pallas_src>

<mosaic_0001>
module attributes {stable_mosaic.version = 11 : i64} {
  func.func @_patch_proj_kernel(%arg0: i32, %arg1: memref<128x128xbf16, #tpu.memory_space<vmem>>, %arg2: memref<128x128xbf16, #tpu.memory_space<vmem>>, %arg3: memref<1x128xf32, #tpu.memory_space<vmem>>, %arg4: memref<128x128xf32, #tpu.memory_space<vmem>>) attributes {dimension_semantics = [#tpu.dimension_semantics<parallel>], iteration_bounds = array<i64: 1>, scalar_prefetch = 0 : i64, scratch_operands = 0 : i64, tpu.core_type = #tpu.core_type<tc>, window_params = [{transform_indices = @transform_0, window_bounds = array<i64: 128, 128>}, {pipeline_mode = #tpu.pipeline_mode<synchronous>, transform_indices = @transform_1, window_bounds = array<i64: 128, 128>}, {pipeline_mode = #tpu.pipeline_mode<synchronous>, transform_indices = @transform_2, window_bounds = array<i64: 1, 128>}, {transform_indices = @transform_3, window_bounds = array<i64: 128, 128>}]} {
    %c0 = arith.constant 0 : index
    %c0_0 = arith.constant 0 : index
    %0 = vector.load %arg1[%c0, %c0_0] : memref<128x128xbf16, #tpu.memory_space<vmem>>, vector<128x128xbf16>
    %c0_1 = arith.constant 0 : index
    %c0_2 = arith.constant 0 : index
    %1 = vector.load %arg2[%c0_1, %c0_2] : memref<128x128xbf16, #tpu.memory_space<vmem>>, vector<128x128xbf16>
    %cst = arith.constant dense<0.000000e+00> : vector<128x128xf32>
    %2 = tpu.matmul %0, %1, %cst {dimension_numbers = #tpu.dot_dimension_numbers<[1], [0], [0], [1], [0, 0, 1, 1], [], []>} : vector<128x128xbf16>, vector<128x128xbf16>, vector<128x128xf32> -> vector<128x128xf32>
    %c0_3 = arith.constant 0 : index
    %c0_4 = arith.constant 0 : index
    %3 = vector.load %arg3[%c0_3, %c0_4] : memref<1x128xf32, #tpu.memory_space<vmem>>, vector<1x128xf32>
    %4 = vector.broadcast %3 : vector<1x128xf32> to vector<128x128xf32>
    %5 = arith.addf %2, %4 : vector<128x128xf32>
    %c0_5 = arith.constant 0 : index
    %c0_6 = arith.constant 0 : index
    %6 = vector.load %arg4[%c0_5, %c0_6] : memref<128x128xf32, #tpu.memory_space<vmem>>, vector<128x128xf32>
    tpu.vector_store %arg4[%c0_5, %c0_6], %5 {strides = array<i32>} : memref<128x128xf32, #tpu.memory_space<vmem>>, vector<128x128xf32>,
    return
  }
  func.func @transform_0(%arg0: i32) -> (i32, i32) {
    %c0_i32 = arith.constant 0 : i32
    %c0_i32_0 = arith.constant 0 : i32
    return %arg0, %c0_i32 : i32, i32
  }
  func.func @transform_1(%arg0: i32) -> (i32, i32) {
    %c0_i32 = arith.constant 0 : i32
    %c0_i32_0 = arith.constant 0 : i32
    %c0_i32_1 = arith.constant 0 : i32
    return %c0_i32, %c0_i32_0 : i32, i32
  }
  func.func @transform_2(%arg0: i32) -> (i32, i32) {
    %c0_i32 = arith.constant 0 : i32
    %c0_i32_0 = arith.constant 0 : i32
    %c0_i32_1 = arith.constant 0 : i32
    return %c0_i32, %c0_i32_0 : i32, i32
  }
  func.func @transform_3(%arg0: i32) -> (i32, i32) {
    %c0_i32 = arith.constant 0 : i32
    %c0_i32_0 = arith.constant 0 : i32
    return %arg0, %c0_i32 : i32, i32
  }
}

</mosaic_0001>

<bundles_post_ra>
// kernel: linear_stem_forward.2
= control target key start
LH: loop header
LB: loop body
LE: loop exit
PB: predicated region body
PF: predicated region fallthrough
CT: control target
= control target key end

     0   :  { %s652_s0 = inlined_call_operand.vmem [shape: bf16[128,128], index: 0, kind: input, shape index: {}]   ;;  %s653_s1 = inlined_call_operand.vmem [shape: f32[1,128], index: 1, kind: input, shape index: {}]   ;;  %s654_s2 = inlined_call_operand.vmem [shape: bf16[32,64], index: 2, kind: input, shape index: {}]   ;;  %s655_s3 = inlined_call_operand.<no memory space> [shape: bf16[], index: 3, kind: input, shape index: {}]   ;;  %s656_s4 = inlined_call_operand.vmem [shape: f32[128,128], index: 4, kind: output, shape index: {}]  }
   0x1   :  { %v9_v0 = vstv %s655_s3 }
   0x2   :  { %v10_v1 = vunpack.i.l.bf16 %v9_v0 }
   0x3   :  { %v522_v2 = vld [vmem:[%s652_s0] sm:$0xff]   ;;  %v32_v3 = vlaneseq  ;;  %v523_v5 = vld [vmem:[%s652_s0 + $0x8] sm:$0xff]   ;;  %v524_v6 = vld [vmem:[%s652_s0 + $0x10] sm:$0xff]   ;;  %v538_v20 = vmov 0.0  }
   0x4   :  { %v430_v4 = vpack.c.bf16 %v10_v1, %v10_v1  ;;  %473 = vmatprep.subr.bf16.mxu0 %v522_v2  ;;  %505 = vmatprep.subr.bf16.mxu1 %v522_v2  ;;  %v525_v8 = vld [vmem:[%s652_s0 + $0x18] sm:$0xff]   ;;  %v29_v9 = vld [vmem:[%s654_s2] sm:$0xff]   ;;  %v408_v10 = vld [vmem:[%s654_s2 + $0x8] sm:$0xff]  }
   0x5   :  { %474 = vmatpush3.bf16.msra.mxu0 %v522_v2  ;;  %513 = vmatpush3.bf16.msra.mxu1 %v522_v2  ;;  %v33_v7 = vand.u32 127, %v32_v3  ;;  %v30_v11 = vunpack.c.l.bf16 %v29_v9  ;;  %v51_v12 = vunpack.c.h.bf16 %v29_v9  ;;  %v73_v14 = vunpack.c.l.bf16 %v408_v10  ;;  %v526_v19 = vld [vmem:[%s652_s0 + $0x20] sm:$0xff]   ;;  %v527_v26 = vld [vmem:[%s652_s0 + $0x28] sm:$0xff]   ;;  %v528_v27 = vld [vmem:[%s652_s0 + $0x30] sm:$0xff]  }
   0x6   :  { %441 = vst [vmem:[#allocation7 + $0x20] sm:$0xff] %v430_v4   ;;  %431 = vst [vmem:[#allocation7 + $0x10] sm:$0xff] %v430_v4   ;;  %475 = vmatprep.subr.bf16.mxu0 %v523_v5  ;;  %506 = vmatprep.subr.bf16.mxu1 %v523_v5  ;;  %v95_v15 = vunpack.c.h.bf16 %v408_v10  ;;  %v529_v29 = vld [vmem:[%s652_s0 + $0x38] sm:$0xff]   ;;  %v410_v36 = vld [vmem:[%s653_s1] ss:$0 sm:$0xff] }
   0x7   :  { %436 = vst [vmem:[#allocation7 + $0x18] sm:$0xff] %v430_v4   ;;  %446 = vst [vmem:[#allocation7 + $0x28] sm:$0xff] %v430_v4   ;;  %vm35_vm0 = vcmp.lt.s32.totalorder %v33_v7, 64 }
   0x8   :  { %451 = vst [vmem:[#allocation7 + $0x30] sm:$0xff] %v430_v4   ;;  %456 = vst [vmem:[#allocation7 + $0x38] sm:$0xff] %v430_v4   ;;  %v36_v16 = vsel %vm35_vm0, %v30_v11, %v10_v1  ;;  %v57_v17 = vsel %vm35_vm0, %v51_v12, %v10_v1  ;;  %v79_v18 = vsel %vm35_vm0, %v73_v14, %v10_v1 }
   0x9   :  { %476 = vmatpush3.bf16.msra.mxu0 %v523_v5  ;;  %514 = vmatpush3.bf16.msra.mxu1 %v523_v5  ;;  %v37_v21 = vpack.c.bf16 %v538_v20, %v36_v16  ;;  %v59_v22 = vpack.c.bf16 %v538_v20, %v57_v17  ;;  %v81_v23 = vpack.c.bf16 %v538_v20, %v79_v18 }
   0xa   :  { %477 = vmatprep.subr.bf16.mxu0 %v524_v6  ;;  %507 = vmatprep.subr.bf16.mxu1 %v524_v6  ;;  %v101_v24 = vsel %vm35_vm0, %v95_v15, %v10_v1 }
   0xb   :  { %39 = vst [vmem:[#allocation7] sm:$0xf] %v37_v21  ;;  %61 = vst [vmem:[#allocation7 + $0x4] sm:$0xf] %v59_v22  ;;  %v103_v25 = vpack.c.bf16 %v538_v20, %v101_v24 }
   0xc   :  { %83 = vst [vmem:[#allocation7 + $0x8] sm:$0xf] %v81_v23 }
   0xd   :  { %v531_v13 = vld [vmem:[#allocation7 + $0x20] sm:$0xff]   ;;  %478 = vmatpush3.bf16.msra.mxu0 %v524_v6  ;;  %515 = vmatpush3.bf16.msra.mxu1 %v524_v6  ;;  %105 = vst [vmem:[#allocation7 + $0xc] sm:$0xf] %v103_v25  ;;  %v534_v32 = vld [vmem:[#allocation7 + $0x10] sm:$0xff]  }
   0xe   :  { %479 = vmatprep.subr.bf16.mxu0 %v525_v8  ;;  %508 = vmatprep.subr.bf16.mxu1 %v525_v8  ;;  %v533_v31 = vld [vmem:[#allocation7 + $0x28] sm:$0xff]   ;;  %v536_v34 = vld [vmem:[#allocation7 + $0x18] sm:$0xff]  }
   0xf   :  { %497 = vmatprep.mubr.bf16.mxu1 %v531_v13  ;;  %v535_v33 = vld [vmem:[#allocation7 + $0x30] sm:$0xff]   ;;  %v537_v35 = vld [vmem:[#allocation7 + $0x38] sm:$0xff]  }
  0x11   :  { %480 = vmatpush3.bf16.msra.mxu0 %v525_v8  ;;  %516 = vmatpush3.bf16.msra.mxu1 %v525_v8 }
  0x12   :  { %481 = vmatprep.subr.bf16.mxu0 %v526_v19  ;;  %509 = vmatprep.subr.bf16.mxu1 %v526_v19  ;;  %v530_v28 = vld [vmem:[#allocation7] sm:$0xff]  }
  0x13   :  { %489 = vmatprep.mubr.bf16.mxu0 %v530_v28 }
  0x14   :  { %v532_v30 = vld [vmem:[#allocation7 + $0x8] sm:$0xff]  }
  0x15   :  { %482 = vmatpush3.bf16.msra.mxu0 %v526_v19  ;;  %517 = vmatpush3.bf16.msra.mxu1 %v526_v19 }
  0x16   :  { %483 = vmatprep.subr.bf16.mxu0 %v527_v26  ;;  %510 = vmatprep.subr.bf16.mxu1 %v527_v26 }
  0x19   :  { %484 = vmatpush3.bf16.msra.mxu0 %v527_v26  ;;  %518 = vmatpush3.bf16.msra.mxu1 %v527_v26 }
  0x1a   :  { %485 = vmatprep.subr.bf16.mxu0 %v528_v27  ;;  %511 = vmatprep.subr.bf16.mxu1 %v528_v27 }
  0x1d   :  { %486 = vmatpush3.bf16.msra.mxu0 %v528_v27  ;;  %519 = vmatpush3.bf16.msra.mxu1 %v528_v27 }
  0x1e   :  { %487 = vmatprep.subr.bf16.mxu0 %v529_v29  ;;  %512 = vmatprep.subr.bf16.mxu1 %v529_v29 }
  0x21   :  { %488 = vmatpush3.bf16.msra.mxu0 %v529_v29  ;;  %520 = vmatpush3.bf16.msra.mxu1 %v529_v29 }
  0x24   :  { %490 = vmatmul.mubr.bf16.vlgmr.msra.gmra.mrb[0].mxu0 %v532_v30  ;;  %498 = vmatmul.mubr.bf16.vlgmr.msra.gmra.mrb[0].mxu1 %v533_v31 }
  0x25   :  { %493 = vmatprep.mubr.bf16.mxu0 %v534_v32  ;;  %501 = vmatprep.mubr.bf16.mxu1 %v535_v33 }
  0x2c   :  { %494 = vmatmul.mubr.bf16.gmra.mrb[4].mxu0 %v536_v34  ;;  %502 = vmatmul.mubr.bf16.gmra.mrb[4].mxu1 %v537_v35 }
  0xf7   :  { %v491_v37 = vpop.f32.mrb[0].mxu0  ;;  %v499_v38 = vpop.f32.mrb[0].mxu1 }
  0xf8   :  { %v333_v39 = vadd.f32 %v491_v37, %v410_v36  ;;  %v365_v40 = vadd.f32 %v499_v38, %v410_v36  ;;  %v324_v41 = vpop.f32.mrb[1].mxu0  ;;  %v356_v42 = vpop.f32.mrb[1].mxu1 }
  0xf9   :  { %v325_v43 = vadd.f32 %v410_v36, %v324_v41  ;;  %v357_v44 = vadd.f32 %v410_v36, %v356_v42  ;;  %v492_v45 = vpop.f32.mrb[2].mxu0  ;;  %v500_v46 = vpop.f32.mrb[2].mxu1 }
  0xfa   :  { %389 = vst [vmem:[%s656_s4 + $0x10] sm:$0xff] %v333_v39  ;;  %397 = vst [vmem:[%s656_s4 + $0x50] sm:$0xff] %v365_v40  ;;  %v336_v47 = vadd.f32 %v492_v45, %v410_v36  ;;  %v368_v48 = vadd.f32 %v500_v46, %v410_v36  ;;  %v327_v49 = vpop.f32.mrb[3].mxu0  ;;  %v359_v50 = vpop.f32.mrb[3].mxu1 }
  0xfb   :  { %387 = vst [vmem:[%s656_s4] sm:$0xff] %v325_v43  ;;  %395 = vst [vmem:[%s656_s4 + $0x40] sm:$0xff] %v357_v44  ;;  %v328_v51 = vadd.f32 %v410_v36, %v327_v49  ;;  %v360_v52 = vadd.f32 %v410_v36, %v359_v50 }
  0xfc   :  { %390 = vst [vmem:[%s656_s4 + $0x18] sm:$0xff] %v336_v47  ;;  %398 = vst [vmem:[%s656_s4 + $0x58] sm:$0xff] %v368_v48 }
  0xfd   :  { %388 = vst [vmem:[%s656_s4 + $0x8] sm:$0xff] %v328_v51  ;;  %396 = vst [vmem:[%s656_s4 + $0x48] sm:$0xff] %v360_v52 }
  0xff   :  { %v495_v53 = vpop.f32.mrb[4].mxu0  ;;  %v503_v54 = vpop.f32.mrb[4].mxu1 }
 0x100   :  { %v349_v55 = vadd.f32 %v495_v53, %v410_v36  ;;  %v381_v56 = vadd.f32 %v503_v54, %v410_v36  ;;  %v340_v57 = vpop.f32.mrb[5].mxu0  ;;  %v372_v58 = vpop.f32.mrb[5].mxu1 }
 0x101   :  { %v341_v59 = vadd.f32 %v410_v36, %v340_v57  ;;  %v373_v60 = vadd.f32 %v410_v36, %v372_v58  ;;  %v496_v61 = vpop.f32.mrb[6].mxu0  ;;  %v504_v62 = vpop.f32.mrb[6].mxu1 }
 0x102   :  { %393 = vst [vmem:[%s656_s4 + $0x30] sm:$0xff] %v349_v55  ;;  %401 = vst [vmem:[%s656_s4 + $0x70] sm:$0xff] %v381_v56  ;;  %v352_v63 = vadd.f32 %v496_v61, %v410_v36  ;;  %v384_v0 = vadd.f32 %v504_v62, %v410_v36  ;;  %v343_v1 = vpop.f32.mrb[7].mxu0  ;;  %v375_v2 = vpop.f32.mrb[7].mxu1 }
 0x103   :  { %391 = vst [vmem:[%s656_s4 + $0x20] sm:$0xff] %v341_v59  ;;  %399 = vst [vmem:[%s656_s4 + $0x60] sm:$0xff] %v373_v60  ;;  %v344_v3 = vadd.f32 %v410_v36, %v343_v1  ;;  %v376_v4 = vadd.f32 %v410_v36, %v375_v2 }
 0x104   :  { %394 = vst [vmem:[%s656_s4 + $0x38] sm:$0xff] %v352_v63  ;;  %402 = vst [vmem:[%s656_s4 + $0x78] sm:$0xff] %v384_v0 }
 0x105   :  { %392 = vst [vmem:[%s656_s4 + $0x28] sm:$0xff] %v344_v3  ;;  %400 = vst [vmem:[%s656_s4 + $0x68] sm:$0xff] %v376_v4 }

</bundles_post_ra>
